<compile_context>
chip_gen: v5e
topology: v5e:2x2
jax: 0.10.0
libtpu: 0.0.40
codegen_flags: <defaults>
</compile_context>

<pallas_src>
import jax
import jax.numpy as jnp
import numpy as np
from jax import lax
from jax.experimental import pallas as pl
from jax.experimental.pallas import tpu as pltpu

# Static model geometry (16x16 single-channel input, LazyLinear(10) => 2304 -> 10).
H0 = W0 = 16
K = 3
C1, H1, W1 = 8, H0 - K + 1, W0 - K + 1       # 8, 14, 14
C2, H2, W2 = 16, H1 - K + 1, W1 - K + 1      # 16, 12, 12
L1 = W1 * C1                                  # 112  packed lane width after conv1
L2 = W2 * C2                                  # 192  packed lane width after conv2
NOUT = 10
NPAD = 128                                    # lane-dense padded logits width
GRP = 16                                      # FC column group stride (power of 2 -> &/>> index math)
CW = NOUT * GRP                               # 160 packed FC columns
MAX_B_TILE = 8


def _mm(a, b):
    return jnp.dot(a, b, preferred_element_type=jnp.float32)


# ----------------------------- fused Pallas kernel ---------------------------------
def _fused_kernel(x_ref, m1_ref, b1_ref, m2_ref, b2_ref, w3_ref, b3_ref, o_ref):
    # x_ref : (BT*16, 16)   stacked images (16 rows each) on the sublane axis
    # m1_ref: (3, 16, 112)  b1_ref: (1, 112)
    # m2_ref: (3, 112, 192) b2_ref: (1, 192)
    # w3_ref: (192, 160)    b3_ref: (1, 128)
    # o_ref : (1, BT, 128)
    n = x_ref.shape[0]                                      # BT*16
    bt = o_ref.shape[1]
    r1 = n - 2
    r2 = n - 4

    x = x_ref[...]                                          # [n, 16]

    # Conv2d(1,8,3) + ReLU  ->  packed h1[r, j*8+co]; rows r with (r%16)>13 are cross-image junk.
    acc1 = _mm(x[0:r1, :], m1_ref[0])
    acc1 = acc1 + _mm(x[1:r1 + 1, :], m1_ref[1])
    acc1 = acc1 + _mm(x[2:r1 + 2, :], m1_ref[2])
    h1 = jnp.maximum(acc1 + b1_ref[...], 0.0)               # [n-2, 112]

    # Conv2d(8,16,3) + ReLU ->  packed h2[r, j*16+co]; rows with (r%16)>11 are junk (never used).
    acc2 = _mm(h1[0:r2, :], m2_ref[0])
    acc2 = acc2 + _mm(h1[1:r2 + 1, :], m2_ref[1])
    acc2 = acc2 + _mm(h1[2:r2 + 2, :], m2_ref[2])
    h2 = jnp.maximum(acc2 + b2_ref[...], 0.0)               # [n-4, 192]

    # Flatten + Linear(2304, 10) on the MXU.
    # w3 block matrix: column c = o*16 + i holds the weights for output o, conv row i
    # (columns with i>=12 are zero, so junk rows contribute exactly 0).
    p = _mm(h2, w3_ref[...])                                # [n-4, 160]

    # keep P[r, c] only where the row index inside the image matches the column's row tag.
    row = lax.broadcasted_iota(jnp.int32, (r2, CW), 0)
    col = lax.broadcasted_iota(jnp.int32, (r2, CW), 1)
    p = jnp.where((row & (GRP - 1)) == (col & (GRP - 1)), p, 0.0)

    # per-image row-group sum (rows r with r//16 == b) as a tiny GEMM.
    bi = lax.broadcasted_iota(jnp.int32, (bt, r2), 0)
    ri = lax.broadcasted_iota(jnp.int32, (bt, r2), 1)
    s = jnp.where((ri >> 4) == bi, 1.0, 0.0)                # [bt, n-4]
    g = _mm(s, p)                                           # [bt, 160]

    # fold the 16-wide column groups back to one logit per output (cols >= 10 stay zero).
    ci = lax.broadcasted_iota(jnp.int32, (CW, NPAD), 0)
    oi = lax.broadcasted_iota(jnp.int32, (CW, NPAD), 1)
    fold = jnp.where((ci >> 4) == oi, 1.0, 0.0)             # [160, 128]
    logits = _mm(g, fold) + b3_ref[...]                     # [bt, 128] lane-dense

    o_ref[0] = logits.astype(o_ref.dtype)


# ------------------------------ wrapper --------------------------------------------
@jax.jit
def image_classifier_forward(x, prepared):
    """x: [B, 1, 16, 16] (NCHW float32) -> logits [B, 10]."""
    m1, b1p, m2, b2p, w3big, b3p = prepared
    B = x.shape[0]
    # Batch tile: amortize per-grid-step overhead, but keep grid >= 2 for B >= 2 (v7x: 2 TCs).
    bt = max(1, min(MAX_B_TILE, pl.cdiv(B, 2)))
    g = pl.cdiv(B, bt)
    b_pad = g * bt

    x2 = x.astype(jnp.float32).reshape(B * H0, W0)          # C == 1; metadata-only reshape
    if b_pad != B:
        x2 = jnp.pad(x2, ((0, (b_pad - B) * H0), (0, 0)))   # zero-pad tail images

    cost = pl.CostEstimate(
        flops=2 * b_pad * (14_112 + 165_888 + 23_040),      # conv1 + conv2 + fc MACs * 2
        transcendentals=0,
        bytes_accessed=404_160 + b_pad * (H0 * W0 + NPAD) * 4,
    )

    out = pl.pallas_call(
        _fused_kernel,
        out_shape=jax.ShapeDtypeStruct((g, bt, NPAD), jnp.float32),
        grid=(g,),
        in_specs=[
            pl.BlockSpec((bt * H0, W0), lambda i: (i, 0)),
            pl.BlockSpec((K, W0, L1), lambda i: (0, 0, 0)),   # weights: constant index maps ->
            pl.BlockSpec((1, L1), lambda i: (0, 0)),          # fetched once, resident in VMEM
            pl.BlockSpec((K, L1, L2), lambda i: (0, 0, 0)),
            pl.BlockSpec((1, L2), lambda i: (0, 0)),
            pl.BlockSpec((L2, CW), lambda i: (0, 0)),
            pl.BlockSpec((1, NPAD), lambda i: (0, 0)),
        ],
        out_specs=pl.BlockSpec((1, bt, NPAD), lambda i: (i, 0, 0)),
        compiler_params=pltpu.CompilerParams(dimension_semantics=("parallel",)),
        cost_estimate=cost,
    )(x2, m1, b1p, m2, b2p, w3big, b3p)

    return out.reshape(b_pad, NPAD)[:B, :NOUT]


# -------------------- one-time weight re-layout (out of the hot path) ---------------
def prepare_params(params):
    """Banded conv matrices + FC block matrix for the lane-packed, batch-stacked layout."""
    w1, b1, w2, b2, w3, b3 = (np.asarray(p, np.float32) for p in params)

    # Conv1: m1[kh, j+kw, j*C1 + co] = w1[co, 0, kh, kw]
    m1 = np.zeros((K, W0, L1), np.float32)
    for kh in range(K):
        for kw in range(K):
            for j in range(W1):
                m1[kh, j + kw, j * C1:(j + 1) * C1] = w1[:, 0, kh, kw]
    b1p = np.tile(b1, W1).reshape(1, L1)

    # Conv2: m2[kh, (j+kw)*C1 + ci, j*C2 + co] = w2[co, ci, kh, kw]
    m2 = np.zeros((K, L1, L2), np.float32)
    for kh in range(K):
        for kw in range(K):
            for j in range(W2):
                m2[kh, (j + kw) * C1:(j + kw + 1) * C1,
                   j * C2:(j + 1) * C2] = w2[:, :, kh, kw].T
    b2p = np.tile(b2, W2).reshape(1, L2)

    # Linear: PyTorch flatten order is (co, i, j); packed h2 lane index is j*C2 + co.
    # Column c = o*16 + i of the block matrix holds w3p[i, :, o]; i in [12,16) stays zero.
    w3p = w3.reshape(NOUT, C2, H2, W2).transpose(2, 3, 1, 0).reshape(H2, L2, NOUT)
    w3big = np.zeros((L2, CW), np.float32)
    for o in range(NOUT):
        for i in range(H2):
            w3big[:, o * GRP + i] = w3p[i, :, o]
    b3p = np.zeros((1, NPAD), np.float32)
    b3p[0, :NOUT] = b3

    return tuple(jnp.asarray(a) for a in (m1, b1p, m2, b2p, w3big, b3p))


# ------------------------------ reference & init -------------------------------------
def reference_forward(x, params):
    """Pure-JAX reference (lax.conv) to validate the Pallas path."""
    w1, b1, w2, b2, w3, b3 = params
    dn = ("NCHW", "OIHW", "NCHW")
    h = lax.conv_general_dilated(x, w1, (1, 1), "VALID", dimension_numbers=dn)
    h = jnp.maximum(h + b1[None, :, None, None], 0.0)
    h = lax.conv_general_dilated(h, w2, (1, 1), "VALID", dimension_numbers=dn)
    h = jnp.maximum(h + b2[None, :, None, None], 0.0)
    h = h.reshape(h.shape[0], -1)
    return h @ w3.T + b3[None, :]


def init_params(key):
    """Deterministic synthetic parameters matching the module's shapes
    (w3 in PyTorch Linear layout [out_features, in_features])."""
    k1, k2, k3, k4, k5, k6 = jax.random.split(key, 6)
    w1 = jax.random.normal(k1, (C1, 1, K, K), jnp.float32) * 0.2
    b1 = jax.random.normal(k2, (C1,), jnp.float32) * 0.1
    w2 = jax.random.normal(k3, (C2, C1, K, K), jnp.float32) * 0.1
    b2 = jax.random.normal(k4, (C2,), jnp.float32) * 0.1
    w3 = jax.random.normal(k5, (NOUT, C2 * H2 * W2), jnp.float32) * 0.02
    b3 = jax.random.normal(k6, (NOUT,), jnp.float32) * 0.1
    return (w1, b1, w2, b2, w3, b3)


if __name__ == "__main__":
    key = jax.random.PRNGKey(0)
    kx, kp = jax.random.split(key)
    params = init_params(kp)
    prepared = prepare_params(params)                        # one-time weight re-layout

    # batch=2 (b_tile=1, grid=2): baseline path, one image per step.
    x = jax.random.normal(kx, (2, 1, 16, 16), jnp.float32)   # NCHW, 1 input channel
    out = jax.block_until_ready(image_classifier_forward(x, prepared))
    assert out.shape == (2, NOUT), out.shape
    ref = jax.block_until_ready(reference_forward(x, params))
    np.testing.assert_allclose(np.asarray(out), np.asarray(ref), rtol=1e-3, atol=1e-3)

    # batch=5 (b_tile=3, grid=2, padded to 6): exercises multi-image stacking + tail padding.
    x5 = jax.random.normal(jax.random.split(kx)[0], (5, 1, 16, 16), jnp.float32)
    out5 = jax.block_until_ready(image_classifier_forward(x5, prepared))
    ref5 = jax.block_until_ready(reference_forward(x5, params))
    np.testing.assert_allclose(np.asarray(out5), np.asarray(ref5), rtol=1e-3, atol=1e-3)

    print("KERNEL_OK")
</pallas_src>

<mosaic_0001>
module attributes {stable_mosaic.version = 11 : i64} {
  func.func @_fused_kernel(%arg0: i32, %arg1: memref<16x16xf32, #tpu.memory_space<vmem>>, %arg2: memref<3x16x112xf32, #tpu.memory_space<vmem>>, %arg3: memref<1x112xf32, #tpu.memory_space<vmem>>, %arg4: memref<3x112x192xf32, #tpu.memory_space<vmem>>, %arg5: memref<1x192xf32, #tpu.memory_space<vmem>>, %arg6: memref<192x160xf32, #tpu.memory_space<vmem>>, %arg7: memref<1x128xf32, #tpu.memory_space<vmem>>, %arg8: memref<1x1x128xf32, #tpu.memory_space<vmem>>) attributes {dimension_semantics = [#tpu.dimension_semantics<parallel>], iteration_bounds = array<i64: 2>, scalar_prefetch = 0 : i64, scratch_operands = 0 : i64, tpu.core_type = #tpu.core_type<tc>, window_params = [{transform_indices = @transform_0, window_bounds = array<i64: 16, 16>}, {pipeline_mode = #tpu.pipeline_mode<synchronous>, transform_indices = @transform_1, window_bounds = array<i64: 3, 16, 112>}, {pipeline_mode = #tpu.pipeline_mode<synchronous>, transform_indices = @transform_2, window_bounds = array<i64: 1, 112>}, {pipeline_mode = #tpu.pipeline_mode<synchronous>, transform_indices = @transform_3, window_bounds = array<i64: 3, 112, 192>}, {pipeline_mode = #tpu.pipeline_mode<synchronous>, transform_indices = @transform_4, window_bounds = array<i64: 1, 192>}, {pipeline_mode = #tpu.pipeline_mode<synchronous>, transform_indices = @transform_5, window_bounds = array<i64: 192, 160>}, {pipeline_mode = #tpu.pipeline_mode<synchronous>, transform_indices = @transform_6, window_bounds = array<i64: 1, 128>}, {transform_indices = @transform_7, window_bounds = array<i64: 1, 1, 128>}]} {
    %c0 = arith.constant 0 : index
    %c0_0 = arith.constant 0 : index
    %0 = vector.load %arg1[%c0, %c0_0] : memref<16x16xf32, #tpu.memory_space<vmem>>, vector<16x16xf32>
    %1 = vector.extract_strided_slice %0 {offsets = [0, 0], sizes = [14, 16], strides = [1, 1]} : vector<16x16xf32> to vector<14x16xf32>
    %c0_1 = arith.constant 0 : index
    %c0_2 = arith.constant 0 : index
    %c0_3 = arith.constant 0 : index
    %2 = vector.load %arg2[%c0_1, %c0_2, %c0_3] : memref<3x16x112xf32, #tpu.memory_space<vmem>>, vector<1x16x112xf32>
    %3 = vector.shape_cast %2 : vector<1x16x112xf32> to vector<16x112xf32>
    %cst = arith.constant dense<0.000000e+00> : vector<14x112xf32>
    %4 = tpu.matmul %1, %3, %cst {dimension_numbers = #tpu.dot_dimension_numbers<[1], [0], [0], [1], [0, 0, 1, 1], [], []>} : vector<14x16xf32>, vector<16x112xf32>, vector<14x112xf32> -> vector<14x112xf32>
    %5 = vector.extract_strided_slice %0 {offsets = [1, 0], sizes = [14, 16], strides = [1, 1]} : vector<16x16xf32> to vector<14x16xf32>
    %c1 = arith.constant 1 : index
    %c0_4 = arith.constant 0 : index
    %c0_5 = arith.constant 0 : index
    %6 = vector.load %arg2[%c1, %c0_4, %c0_5] : memref<3x16x112xf32, #tpu.memory_space<vmem>>, vector<1x16x112xf32>
    %7 = vector.shape_cast %6 : vector<1x16x112xf32> to vector<16x112xf32>
    %cst_6 = arith.constant dense<0.000000e+00> : vector<14x112xf32>
    %8 = tpu.matmul %5, %7, %cst_6 {dimension_numbers = #tpu.dot_dimension_numbers<[1], [0], [0], [1], [0, 0, 1, 1], [], []>} : vector<14x16xf32>, vector<16x112xf32>, vector<14x112xf32> -> vector<14x112xf32>
    %9 = arith.addf %4, %8 : vector<14x112xf32>
    %10 = vector.extract_strided_slice %0 {offsets = [2, 0], sizes = [14, 16], strides = [1, 1]} : vector<16x16xf32> to vector<14x16xf32>
    %c2 = arith.constant 2 : index
    %c0_7 = arith.constant 0 : index
    %c0_8 = arith.constant 0 : index
    %11 = vector.load %arg2[%c2, %c0_7, %c0_8] : memref<3x16x112xf32, #tpu.memory_space<vmem>>, vector<1x16x112xf32>
    %12 = vector.shape_cast %11 : vector<1x16x112xf32> to vector<16x112xf32>
    %cst_9 = arith.constant dense<0.000000e+00> : vector<14x112xf32>
    %13 = tpu.matmul %10, %12, %cst_9 {dimension_numbers = #tpu.dot_dimension_numbers<[1], [0], [0], [1], [0, 0, 1, 1], [], []>} : vector<14x16xf32>, vector<16x112xf32>, vector<14x112xf32> -> vector<14x112xf32>
    %14 = arith.addf %9, %13 : vector<14x112xf32>
    %c0_10 = arith.constant 0 : index
    %c0_11 = arith.constant 0 : index
    %15 = vector.load %arg3[%c0_10, %c0_11] : memref<1x112xf32, #tpu.memory_space<vmem>>, vector<1x112xf32>
    %16 = vector.broadcast %15 : vector<1x112xf32> to vector<14x112xf32>
    %17 = arith.addf %14, %16 : vector<14x112xf32>
    %cst_12 = arith.constant 0.000000e+00 : f32
    %18 = vector.broadcast %cst_12 : f32 to vector<14x112xf32>
    %19 = arith.maximumf %17, %18 : vector<14x112xf32>
    %20 = vector.extract_strided_slice %19 {offsets = [0, 0], sizes = [12, 112], strides = [1, 1]} : vector<14x112xf32> to vector<12x112xf32>
    %c0_13 = arith.constant 0 : index
    %c0_14 = arith.constant 0 : index
    %c0_15 = arith.constant 0 : index
    %21 = vector.load %arg4[%c0_13, %c0_14, %c0_15] : memref<3x112x192xf32, #tpu.memory_space<vmem>>, vector<1x112x192xf32>
    %22 = vector.shape_cast %21 : vector<1x112x192xf32> to vector<112x192xf32>
    %cst_16 = arith.constant dense<0.000000e+00> : vector<12x192xf32>
    %23 = tpu.matmul %20, %22, %cst_16 {dimension_numbers = #tpu.dot_dimension_numbers<[1], [0], [0], [1], [0, 0, 1, 1], [], []>} : vector<12x112xf32>, vector<112x192xf32>, vector<12x192xf32> -> vector<12x192xf32>
    %24 = vector.extract_strided_slice %19 {offsets = [1, 0], sizes = [12, 112], strides = [1, 1]} : vector<14x112xf32> to vector<12x112xf32>
    %c1_17 = arith.constant 1 : index
    %c0_18 = arith.constant 0 : index
    %c0_19 = arith.constant 0 : index
    %25 = vector.load %arg4[%c1_17, %c0_18, %c0_19] : memref<3x112x192xf32, #tpu.memory_space<vmem>>, vector<1x112x192xf32>
    %26 = vector.shape_cast %25 : vector<1x112x192xf32> to vector<112x192xf32>
    %cst_20 = arith.constant dense<0.000000e+00> : vector<12x192xf32>
    %27 = tpu.matmul %24, %26, %cst_20 {dimension_numbers = #tpu.dot_dimension_numbers<[1], [0], [0], [1], [0, 0, 1, 1], [], []>} : vector<12x112xf32>, vector<112x192xf32>, vector<12x192xf32> -> vector<12x192xf32>
    %28 = arith.addf %23, %27 : vector<12x192xf32>
    %29 = vector.extract_strided_slice %19 {offsets = [2, 0], sizes = [12, 112], strides = [1, 1]} : vector<14x112xf32> to vector<12x112xf32>
    %c2_21 = arith.constant 2 : index
    %c0_22 = arith.constant 0 : index
    %c0_23 = arith.constant 0 : index
    %30 = vector.load %arg4[%c2_21, %c0_22, %c0_23] : memref<3x112x192xf32, #tpu.memory_space<vmem>>, vector<1x112x192xf32>
    %31 = vector.shape_cast %30 : vector<1x112x192xf32> to vector<112x192xf32>
    %cst_24 = arith.constant dense<0.000000e+00> : vector<12x192xf32>
    %32 = tpu.matmul %29, %31, %cst_24 {dimension_numbers = #tpu.dot_dimension_numbers<[1], [0], [0], [1], [0, 0, 1, 1], [], []>} : vector<12x112xf32>, vector<112x192xf32>, vector<12x192xf32> -> vector<12x192xf32>
    %33 = arith.addf %28, %32 : vector<12x192xf32>
    %c0_25 = arith.constant 0 : index
    %c0_26 = arith.constant 0 : index
    %34 = vector.load %arg5[%c0_25, %c0_26] : memref<1x192xf32, #tpu.memory_space<vmem>>, vector<1x192xf32>
    %35 = vector.broadcast %34 : vector<1x192xf32> to vector<12x192xf32>
    %36 = arith.addf %33, %35 : vector<12x192xf32>
    %cst_27 = arith.constant 0.000000e+00 : f32
    %37 = vector.broadcast %cst_27 : f32 to vector<12x192xf32>
    %38 = arith.maximumf %36, %37 : vector<12x192xf32>
    %c0_28 = arith.constant 0 : index
    %c0_29 = arith.constant 0 : index
    %39 = vector.load %arg6[%c0_28, %c0_29] : memref<192x160xf32, #tpu.memory_space<vmem>>, vector<192x160xf32>
    %cst_30 = arith.constant dense<0.000000e+00> : vector<12x160xf32>
    %40 = tpu.matmul %38, %39, %cst_30 {dimension_numbers = #tpu.dot_dimension_numbers<[1], [0], [0], [1], [0, 0, 1, 1], [], []>} : vector<12x192xf32>, vector<192x160xf32>, vector<12x160xf32> -> vector<12x160xf32>
    %41 = tpu.iota {dimensions = array<i32: 0>} : vector<12x160xi32>
    %42 = tpu.iota {dimensions = array<i32: 1>} : vector<12x160xi32>
    %c15_i32 = arith.constant 15 : i32
    %43 = vector.broadcast %c15_i32 : i32 to vector<12x160xi32>
    %44 = arith.andi %41, %43 : vector<12x160xi32>
    %c15_i32_31 = arith.constant 15 : i32
    %45 = vector.broadcast %c15_i32_31 : i32 to vector<12x160xi32>
    %46 = arith.andi %42, %45 : vector<12x160xi32>
    %47 = arith.cmpi eq, %44, %46 : vector<12x160xi32>
    %cst_32 = arith.constant 0.000000e+00 : f32
    %48 = vector.broadcast %cst_32 : f32 to vector<12x160xf32>
    %49 = arith.select %47, %40, %48 : vector<12x160xi1>, vector<12x160xf32>
    %50 = tpu.iota {dimensions = array<i32: 0>} : vector<1x12xi32>
    %51 = tpu.iota {dimensions = array<i32: 1>} : vector<1x12xi32>
    %c4_i32 = arith.constant 4 : i32
    %52 = vector.broadcast %c4_i32 : i32 to vector<1x12xi32>
    %53 = arith.shrsi %51, %52 : vector<1x12xi32>
    %54 = arith.cmpi eq, %53, %50 : vector<1x12xi32>
    %cst_33 = arith.constant 1.000000e+00 : f32
    %cst_34 = arith.constant 0.000000e+00 : f32
    %55 = vector.broadcast %cst_33 : f32 to vector<1x12xf32>
    %56 = vector.broadcast %cst_34 : f32 to vector<1x12xf32>
    %57 = arith.select %54, %55, %56 : vector<1x12xi1>, vector<1x12xf32>
    %cst_35 = arith.constant dense<0.000000e+00> : vector<1x160xf32>
    %58 = tpu.matmul %57, %49, %cst_35 {dimension_numbers = #tpu.dot_dimension_numbers<[1], [0], [0], [1], [0, 0, 1, 1], [], []>} : vector<1x12xf32>, vector<12x160xf32>, vector<1x160xf32> -> vector<1x160xf32>
    %59 = tpu.iota {dimensions = array<i32: 0>} : vector<160x128xi32>
    %60 = tpu.iota {dimensions = array<i32: 1>} : vector<160x128xi32>
    %c4_i32_36 = arith.constant 4 : i32
    %61 = vector.broadcast %c4_i32_36 : i32 to vector<160x128xi32>
    %62 = arith.shrsi %59, %61 : vector<160x128xi32>
    %63 = arith.cmpi eq, %62, %60 : vector<160x128xi32>
    %cst_37 = arith.constant 1.000000e+00 : f32
    %cst_38 = arith.constant 0.000000e+00 : f32
    %64 = vector.broadcast %cst_37 : f32 to vector<160x128xf32>
    %65 = vector.broadcast %cst_38 : f32 to vector<160x128xf32>
    %66 = arith.select %63, %64, %65 : vector<160x128xi1>, vector<160x128xf32>
    %cst_39 = arith.constant dense<0.000000e+00> : vector<1x128xf32>
    %67 = tpu.matmul %58, %66, %cst_39 {dimension_numbers = #tpu.dot_dimension_numbers<[1], [0], [0], [1], [0, 0, 1, 1], [], []>} : vector<1x160xf32>, vector<160x128xf32>, vector<1x128xf32> -> vector<1x128xf32>
    %c0_40 = arith.constant 0 : index
    %c0_41 = arith.constant 0 : index
    %68 = vector.load %arg7[%c0_40, %c0_41] : memref<1x128xf32, #tpu.memory_space<vmem>>, vector<1x128xf32>
    %69 = arith.addf %67, %68 : vector<1x128xf32>
    %c0_42 = arith.constant 0 : index
    %c0_43 = arith.constant 0 : index
    %c0_44 = arith.constant 0 : index
    %70 = vector.load %arg8[%c0_42, %c0_43, %c0_44] : memref<1x1x128xf32, #tpu.memory_space<vmem>>, vector<1x1x128xf32>
    %71 = vector.shape_cast %70 : vector<1x1x128xf32> to vector<1x128xf32>
    %72 = vector.shape_cast %69 : vector<1x128xf32> to vector<1x1x128xf32>
    tpu.vector_store %arg8[%c0_42, %c0_43, %c0_44], %72 {strides = array<i32>} : memref<1x1x128xf32, #tpu.memory_space<vmem>>, vector<1x1x128xf32>,
    return
  }
  func.func @transform_0(%arg0: i32) -> (i32, i32) {
    %c0_i32 = arith.constant 0 : i32
    %c0_i32_0 = arith.constant 0 : i32
    return %arg0, %c0_i32 : i32, i32
  }
  func.func @transform_1(%arg0: i32) -> (i32, i32, i32) {
    %c0_i32 = arith.constant 0 : i32
    %c0_i32_0 = arith.constant 0 : i32
    %c0_i32_1 = arith.constant 0 : i32
    %c0_i32_2 = arith.constant 0 : i32
    return %c0_i32, %c0_i32_0, %c0_i32_1 : i32, i32, i32
  }
  func.func @transform_2(%arg0: i32) -> (i32, i32) {
    %c0_i32 = arith.constant 0 : i32
    %c0_i32_0 = arith.constant 0 : i32
    %c0_i32_1 = arith.constant 0 : i32
    return %c0_i32, %c0_i32_0 : i32, i32
  }
  func.func @transform_3(%arg0: i32) -> (i32, i32, i32) {
    %c0_i32 = arith.constant 0 : i32
    %c0_i32_0 = arith.constant 0 : i32
    %c0_i32_1 = arith.constant 0 : i32
    %c0_i32_2 = arith.constant 0 : i32
    return %c0_i32, %c0_i32_0, %c0_i32_1 : i32, i32, i32
  }
  func.func @transform_4(%arg0: i32) -> (i32, i32) {
    %c0_i32 = arith.constant 0 : i32
    %c0_i32_0 = arith.constant 0 : i32
    %c0_i32_1 = arith.constant 0 : i32
    return %c0_i32, %c0_i32_0 : i32, i32
  }
  func.func @transform_5(%arg0: i32) -> (i32, i32) {
    %c0_i32 = arith.constant 0 : i32
    %c0_i32_0 = arith.constant 0 : i32
    %c0_i32_1 = arith.constant 0 : i32
    return %c0_i32, %c0_i32_0 : i32, i32
  }
  func.func @transform_6(%arg0: i32) -> (i32, i32) {
    %c0_i32 = arith.constant 0 : i32
    %c0_i32_0 = arith.constant 0 : i32
    %c0_i32_1 = arith.constant 0 : i32
    return %c0_i32, %c0_i32_0 : i32, i32
  }
  func.func @transform_7(%arg0: i32) -> (i32, i32, i32) {
    %c0_i32 = arith.constant 0 : i32
    %c0_i32_0 = arith.constant 0 : i32
    %c0_i32_1 = arith.constant 0 : i32
    return %arg0, %c0_i32, %c0_i32_0 : i32, i32, i32
  }
}

</mosaic_0001>

<bundles_post_ra>
// kernel: image_classifier_forward.1
= control target key start
LH: loop header
LB: loop body
LE: loop exit
PB: predicated region body
PF: predicated region fallthrough
CT: control target
= control target key end

     0   :  { %12 = vsyncpa [#allocation3], 0  ;;  %s1961_s0 = inlined_call_operand.vmem [shape: f32[32,16], index: 0, kind: input, shape index: {}]   ;;  %s1962_s1 = inlined_call_operand.vmem [shape: f32[3,16,112], index: 1, kind: input, shape index: {}]   ;;  %s1963_s2 = inlined_call_operand.vmem [shape: f32[1,112], index: 2, kind: input, shape index: {}]   ;;  %s1964_s3 = inlined_call_operand.vmem [shape: f32[3,112,192], index: 3, kind: input, shape index: {}]   ;;  %s1965_s4 = inlined_call_operand.vmem [shape: f32[1,192], index: 4, kind: input, shape index: {}]   ;;  %s1966_s5 = inlined_call_operand.vmem [shape: f32[192,160], index: 5, kind: input, shape index: {}]   ;;  %s1967_s6 = inlined_call_operand.vmem [shape: f32[1,128], index: 6, kind: input, shape index: {}]   ;;  %s1968_s7 = inlined_call_operand.hbm [shape: f32[2,1,128], index: 7, kind: output, shape index: {}]  }
   0x1   :  { %14 = vsyncpa [#allocation3 + $0x1], 0  ;;  %s1337_s24 = smov 0   ;;  %s1339_s25 = smov 0  }
   0x2   :  { %s1341_s26 = smov 0   ;;  %s1343_s27 = smov 0  }
   0x3 LB: > { %s1358_s28 = sadd.s32 4294967295, %s1293_s27   ;;  %s1064_s29 = sadd.s32 4294967294, %s1293_s27   ;;  %s1293_s27 = sphi %s1343_s27, %s1976_s27   ;;  %s1289_s26 = sphi %s1341_s26, %s1975_s26   ;;  %s1285_s25 = sphi %s1339_s25, %s1974_s25   ;;  %s1281_s24 = sphi %s1337_s24, %s1973_s24  }
   0x4   : > { %s1362_s30 = sadd.s32 1, %s1293_s27   ;;  %s179_s8 = sadd.s32 1, %s1289_s26 }
   0x5   : > { %s176_s9 = ssub.s32 %s1293_s27, %s1362_s30  ;;  %p189_p0 = scmp.ne.s32.totalorder %s1289_s26, %s1285_s25 }
   0x6   : > { %p177_p1 = scmp.eq.s32.totalorder %s176_s9, 0  ;;  %p190_p2 = scmp.eq.s32.totalorder %s1358_s28, 1 }
   0x7   : > { %p195_p3 = scmp.ne.s32.totalorder %s1285_s25, %s1281_s24  ;;  %p196_p4 = scmp.eq.s32.totalorder %s1064_s29, 1 }
   0x8   : > { %s1373_s10 = scalar_select %p177_p1, %s1289_s26, %s179_s8  }
   0x9   : > { %p1375_p5 = por %p190_p2, %p189_p0  ;;  %p1379_p6 = por %p196_p4, %p195_p3 }
   0xa   : > { %p1067_p7 = scmp.ge.s32.totalorder %s1293_s27, 1  ;;  %p241_p8 = scmp.lt.s32.totalorder %s1293_s27, 3 }
   0xc   : > { %p242_p9 = pnand %p1067_p7, %p241_p8 }
   0xd   : > { %s1068_s17 = sshll.u32 (!%p242_p9), %s1358_s28, 1  ;;  %s270_s20 = sand.u32 (!%p242_p9), 1, %s1285_s25  }
   0xe   : > { %245 = sbr.rel (%p242_p9) target bundleno = 746 (0x2ea), region = 48  ;;  %p273_p10 = scmp.lt.s32.totalorder (!%p242_p9), %s1068_s17, 3 }
   0xf   : > { %s1005_s29 = scalar_lea.hbm (!%p242_p9), %s1968_s7, %s1358_s28  ;;  %s271_s8 = scalar_lea.vmem (!%p242_p9), [#allocation2], %s270_s20 }
  0x10   : > { %s1007_s9 = sshll.u32 (!%p242_p9), %s271_s8, 4  ;;  %s997_s14 = scalar_lea.sflag (!%p242_p9), [#allocation3], %s270_s20  ;;  %s1008_s9 = int_to_ptr.vmem [resolvable:$true] %s1007_s9 }
  0x11   : > { %s1251_s28 = scalar_lea.hbm (!%p242_p9), %s1968_s7, 2 }
  0x13   : > { %v1077_v0 = vld [vmem:[%s1962_s1 + $0x28] sm:$0xff]  ;;  %v1076_v1 = vld [vmem:[%s1962_s1 + $0x20] sm:$0xff]  ;;  %v1071_v2 = vld [vmem:[%s1962_s1 + $0x18] sm:$0xff]  ;;  %s1978_s17 = smov (!%p273_p10, %s1068_s17), 3  ;;  %vm291_vm0 = vcmask 130048   ;;  %vm349_vm1 = vcmask 1045504  }
  0x14   : > { %371 = vmatpush.msra.mxu2 %v1077_v0  ;;  %310 = vmatpush.msra.mxu0 %v1071_v2  ;;  %v281_v3 = vld [vmem:[%s1962_s1 + $0x8] sm:$0xff]  ;;  %v1070_v4 = vld [vmem:[%s1962_s1 + $0x10] sm:$0xff]  ;;  %v280_v5 = vld [vmem:[%s1962_s1] sm:$0xff]  ;;  %s1069_s13 = sshll.u32 %s1978_s17, 3  ;;  %vm287_vm2 = vcmask 1046528   ;;  %vm452_vm3 = vcmask 916480  }
  0x15   : > { %337 = vmatpush.msra.mxu1 %v281_v3  ;;  %v1106_v6 = vld [vmem:[%s1964_s3 + $0x1b0] sm:$0xff]  ;;  %v1107_v7 = vld [vmem:[%s1964_s3 + $0x1b8] sm:$0xff]  ;;  %v1104_v10 = vld [vmem:[%s1964_s3 + $0x1a0] sm:$0xff]  ;;  %s276_s19 = scalar_lea.vmem %s1961_s0, %s1069_s13  ;;  %vm701_vm4 = vcmask 523264   ;;  %vm825_vm10 = vcmask 1043456   ;;  %vm821_vm15 = vcmask 97280  }
  0x16   : > { %v416_v8 = vld [vmem:[%s1964_s3 + $0xd0] sm:$0xff]  ;;  %372 = vmatpush.msra.mxu2 %v1076_v1  ;;  %311 = vmatpush.msra.mxu0 %v1070_v4  ;;  %v417_v9 = vld [vmem:[%s1964_s3 + $0xd8] sm:$0xff]  ;;  %v1105_v11 = vld [vmem:[%s1964_s3 + $0x1a8] sm:$0xff]  ;;  %s1009_s13 = sshll.u32 %s1005_s29, 4  ;;  %s1010_s13 = int_to_ptr.hbm [resolvable:$true] %s1009_s13 }
  0x17   : > { %338 = vmatpush.msra.mxu1 %v280_v5  ;;  %459 = vmatpush.msra.mxu3 %v1106_v6  ;;  %v414_v12 = vld [vmem:[%s1964_s3 + $0xc0] sm:$0xff]  ;;  %v415_v13 = vld [vmem:[%s1964_s3 + $0xc8] sm:$0xff]  ;;  %v1102_v14 = vld [vmem:[%s1964_s3 + $0x190] sm:$0xff]  ;;  %s1245_s15 = sshra.s32 %s1010_s13, 4  ;;  %s1246_s15 = int_to_ptr.hbm [resolvable:$true] %s1245_s15 }
  0x18   : > { %482 = vmatpush.msrb.mxu0 %v1107_v7  ;;  %532 = vmatpush.msrb.mxu2 %v417_v9  ;;  %v1103_v15 = vld [vmem:[%s1964_s3 + $0x198] sm:$0xff]  ;;  %v412_v16 = vld [vmem:[%s1964_s3 + $0xb0] sm:$0xff]  ;;  %v278_v17 = vld [vmem:[%s276_s19] sm:$0xff]  ;;  %s1247_s16 = scalar_lea.hbm %s1246_s15, 1  ;;  %p1252_p0 = scmp.lt.s32.totalorder %s1246_s15, %s1968_s7 }
  0x19   : > { %509 = vmatpush.msrb.mxu1 %v416_v8  ;;  %460 = vmatpush.msra.mxu3 %v1104_v10  ;;  %v279_v18 = vld [vmem:[%s276_s19 + $0x8] sm:$0xff]  ;;  %v413_v19 = vld [vmem:[%s1964_s3 + $0xb8] sm:$0xff]  ;;  %v350_v20 = vrot.slane %v278_v17, 2  ;;  %v288_v22 = vrot.slane %v278_v17, 1  ;;  %v1100_v24 = vld [vmem:[%s1964_s3 + $0x180] sm:$0xff]  ;;  %p1248_p11 = scmp.ne.s32.totalorder %s1246_s15, %s1247_s16  ;;  %p1253_p1 = scmp.lt.s32.totalorder %s1251_s28, %s1247_s16 }
  0x1a   : > { %483 = vmatpush.msrb.mxu0 %v1105_v11  ;;  %v351_v21 = vrot.slane %v279_v18, 2  ;;  %v289_v23 = vrot.slane %v279_v18, 1  ;;  %1074 = vmatmul.msk.f32.vlgmr.msra.gmra.mxu1 %vm291_vm0, %v278_v17  ;;  %v1101_v25 = vld [vmem:[%s1964_s3 + $0x188] sm:$0xff]  ;;  %v410_v28 = vld [vmem:[%s1964_s3 + $0xa0] sm:$0xff]  ;;  %v1098_v30 = vld [vmem:[%s1964_s3 + $0x170] sm:$0xff] }
  0x1b   : > { %510 = vmatpush.msrb.mxu1 %v414_v12  ;;  %533 = vmatpush.msrb.mxu2 %v415_v13  ;;  %v411_v29 = vld [vmem:[%s1964_s3 + $0xa8] sm:$0xff]  ;;  %v1099_v31 = vld [vmem:[%s1964_s3 + $0x178] sm:$0xff]  ;;  %v408_v32 = vld [vmem:[%s1964_s3 + $0x90] sm:$0xff]  ;;  %p1249_p12 = pnand %p1248_p11, %p1375_p5  ;;  %p1254_p2 = por %p1253_p1, %p1252_p0 }
  0x1c   : > { %461 = vmatpush.msra.mxu3 %v1102_v14  ;;  %484 = vmatpush.msrb.mxu0 %v1103_v15  ;;  %v352_v26 = vsel %vm349_vm1, %v350_v20, %v351_v21  ;;  %v290_v27 = vsel %vm287_vm2, %v288_v22, %v289_v23  ;;  %v409_v33 = vld [vmem:[%s1964_s3 + $0x98] sm:$0xff]  ;;  %v1096_v34 = vld [vmem:[%s1964_s3 + $0x160] sm:$0xff]  ;;  %v1097_v35 = vld [vmem:[%s1964_s3 + $0x168] sm:$0xff] }
  0x1d   : > { %511 = vmatpush.msrb.mxu1 %v412_v16  ;;  %534 = vmatpush.msrb.mxu2 %v413_v19  ;;  %v406_v36 = vld [vmem:[%s1964_s3 + $0x80] sm:$0xff]  ;;  %v407_v37 = vld [vmem:[%s1964_s3 + $0x88] sm:$0xff]  ;;  %v1094_v38 = vld [vmem:[%s1964_s3 + $0x150] sm:$0xff]  ;;  %p1250_p13 = pneg %p1249_p12 }
  0x1e   : > { %1078 = vmatmul.msk.f32.vlgmr.msra.gmra.mxu2 %vm291_vm0, %v352_v26  ;;  %1072 = vmatmul.msk.f32.vlgmr.msra.gmra.mxu0 %vm291_vm0, %v290_v27  ;;  %v1095_v39 = vld [vmem:[%s1964_s3 + $0x158] sm:$0xff]  ;;  %v404_v40 = vld [vmem:[%s1964_s3 + $0x70] sm:$0xff]  ;;  %v1092_v42 = vld [vmem:[%s1964_s3 + $0x140] sm:$0xff] }
  0x1f   : > { %462 = vmatpush.msra.mxu3 %v1100_v24  ;;  %485 = vmatpush.msrb.mxu0 %v1101_v25  ;;  %v405_v41 = vld [vmem:[%s1964_s3 + $0x78] sm:$0xff]  ;;  %v1093_v43 = vld [vmem:[%s1964_s3 + $0x148] sm:$0xff]  ;;  %v402_v44 = vld [vmem:[%s1964_s3 + $0x60] sm:$0xff]  ;;  %p1255_p3 = pnand %p1254_p2, %p1250_p13 }
  0x20   : > { %512 = vmatpush.msrb.mxu1 %v410_v28  ;;  %535 = vmatpush.msrb.mxu2 %v411_v29  ;;  %v403_v45 = vld [vmem:[%s1964_s3 + $0x68] sm:$0xff]  ;;  %v1090_v46 = vld [vmem:[%s1964_s3 + $0x130] sm:$0xff]  ;;  %v1091_v47 = vld [vmem:[%s1964_s3 + $0x138] sm:$0xff] }
  0x21   : > { %463 = vmatpush.msra.mxu3 %v1098_v30  ;;  %486 = vmatpush.msrb.mxu0 %v1099_v31  ;;  %v400_v48 = vld [vmem:[%s1964_s3 + $0x50] sm:$0xff]  ;;  %v401_v49 = vld [vmem:[%s1964_s3 + $0x58] sm:$0xff]  ;;  %v1088_v50 = vld [vmem:[%s1964_s3 + $0x120] sm:$0xff] }
  0x22   : > { %513 = vmatpush.msrb.mxu1 %v408_v32  ;;  %536 = vmatpush.msrb.mxu2 %v409_v33  ;;  %v1089_v51 = vld [vmem:[%s1964_s3 + $0x128] sm:$0xff]  ;;  %v398_v52 = vld [vmem:[%s1964_s3 + $0x40] sm:$0xff]  ;;  %v1086_v54 = vld [vmem:[%s1964_s3 + $0x110] sm:$0xff] }
  0x23   : > { %1075 = vmatmul.msk.f32.gmra.mxu1 %vm291_vm0, %v279_v18  ;;  %464 = vmatpush.msra.mxu3 %v1096_v34  ;;  %v399_v53 = vld [vmem:[%s1964_s3 + $0x48] sm:$0xff]  ;;  %v1087_v55 = vld [vmem:[%s1964_s3 + $0x118] sm:$0xff]  ;;  %v396_v56 = vld [vmem:[%s1964_s3 + $0x30] sm:$0xff] }
  0x24   : > { %487 = vmatpush.msrb.mxu0 %v1097_v35  ;;  %514 = vmatpush.msrb.mxu1 %v406_v36  ;;  %v397_v57 = vld [vmem:[%s1964_s3 + $0x38] sm:$0xff]  ;;  %v1084_v58 = vld [vmem:[%s1964_s3 + $0x100] sm:$0xff]  ;;  %v1085_v59 = vld [vmem:[%s1964_s3 + $0x108] sm:$0xff] }
  0x25   : > { %537 = vmatpush.msrb.mxu2 %v407_v37  ;;  %465 = vmatpush.msra.mxu3 %v1094_v38  ;;  %v394_v60 = vld [vmem:[%s1964_s3 + $0x20] sm:$0xff]  ;;  %v395_v61 = vld [vmem:[%s1964_s3 + $0x28] sm:$0xff]  ;;  %v1082_v62 = vld [vmem:[%s1964_s3 + $0xf0] sm:$0xff] }
  0x26   : > { %1079 = vmatmul.msk.f32.gmra.mxu2 %vm291_vm0, %v351_v21  ;;  %1073 = vmatmul.msk.f32.gmra.mxu0 %vm291_vm0, %v289_v23  ;;  %v1083_v63 = vld [vmem:[%s1964_s3 + $0xf8] sm:$0xff]  ;;  %v392_v0 = vld [vmem:[%s1964_s3 + $0x10] sm:$0xff]  ;;  %v1080_v2 = vld [vmem:[%s1964_s3 + $0xe0] sm:$0xff] }
  0x27   : > { %488 = vmatpush.msrb.mxu0 %v1095_v39  ;;  %515 = vmatpush.msrb.mxu1 %v404_v40  ;;  %v393_v1 = vld [vmem:[%s1964_s3 + $0x18] sm:$0xff]  ;;  %v1081_v3 = vld [vmem:[%s1964_s3 + $0xe8] sm:$0xff]  ;;  %v390_v4 = vld [vmem:[%s1964_s3] sm:$0xff] }
  0x28   : > { %538 = vmatpush.msrb.mxu2 %v405_v41  ;;  %466 = vmatpush.msra.mxu3 %v1092_v42  ;;  %v391_v5 = vld [vmem:[%s1964_s3 + $0x8] sm:$0xff]  ;;  %v1142_v6 = vld [vmem:[%s1964_s3 + $0x290] sm:$0xff]  ;;  %v1143_v7 = vld [vmem:[%s1964_s3 + $0x298] sm:$0xff] }
  0x29   : > { %489 = vmatpush.msrb.mxu0 %v1093_v43  ;;  %516 = vmatpush.msrb.mxu1 %v402_v44  ;;  %v1140_v8 = vld [vmem:[%s1964_s3 + $0x280] sm:$0xff]  ;;  %v1141_v9 = vld [vmem:[%s1964_s3 + $0x288] sm:$0xff]  ;;  %v1138_v10 = vld [vmem:[%s1964_s3 + $0x270] sm:$0xff] }
  0x2a   : > { %539 = vmatpush.msrb.mxu2 %v403_v45  ;;  %467 = vmatpush.msra.mxu3 %v1090_v46  ;;  %v1139_v11 = vld [vmem:[%s1964_s3 + $0x278] sm:$0xff]  ;;  %v1136_v12 = vld [vmem:[%s1964_s3 + $0x260] sm:$0xff]  ;;  %v1137_v13 = vld [vmem:[%s1964_s3 + $0x268] sm:$0xff] }
  0x2b   : > { %490 = vmatpush.msrb.mxu0 %v1091_v47  ;;  %517 = vmatpush.msrb.mxu1 %v400_v48  ;;  %v1134_v14 = vld [vmem:[%s1964_s3 + $0x250] sm:$0xff]  ;;  %v1135_v15 = vld [vmem:[%s1964_s3 + $0x258] sm:$0xff]  ;;  %v1132_v16 = vld [vmem:[%s1964_s3 + $0x240] sm:$0xff] }
  0x2c   : > { %540 = vmatpush.msrb.mxu2 %v401_v49  ;;  %468 = vmatpush.msra.mxu3 %v1088_v50  ;;  %v1133_v17 = vld [vmem:[%s1964_s3 + $0x248] sm:$0xff]  ;;  %v1130_v18 = vld [vmem:[%s1964_s3 + $0x230] sm:$0xff]  ;;  %v1131_v19 = vld [vmem:[%s1964_s3 + $0x238] sm:$0xff] }
  0x2d   : > { %491 = vmatpush.msrb.mxu0 %v1089_v51  ;;  %518 = vmatpush.msrb.mxu1 %v398_v52  ;;  %v1128_v20 = vld [vmem:[%s1964_s3 + $0x220] sm:$0xff]  ;;  %v1129_v21 = vld [vmem:[%s1964_s3 + $0x228] sm:$0xff]  ;;  %v1126_v22 = vld [vmem:[%s1964_s3 + $0x210] sm:$0xff] }
  0x2e   : > { %541 = vmatpush.msrb.mxu2 %v399_v53  ;;  %469 = vmatpush.msra.mxu3 %v1086_v54  ;;  %v1127_v23 = vld [vmem:[%s1964_s3 + $0x218] sm:$0xff]  ;;  %v1124_v24 = vld [vmem:[%s1964_s3 + $0x200] sm:$0xff]  ;;  %v1125_v25 = vld [vmem:[%s1964_s3 + $0x208] sm:$0xff] }
  0x2f   : > { %492 = vmatpush.msrb.mxu0 %v1087_v55  ;;  %519 = vmatpush.msrb.mxu1 %v396_v56  ;;  %v1122_v28 = vld [vmem:[%s1964_s3 + $0x1f0] sm:$0xff]  ;;  %v1123_v29 = vld [vmem:[%s1964_s3 + $0x1f8] sm:$0xff]  ;;  %v1120_v30 = vld [vmem:[%s1964_s3 + $0x1e0] sm:$0xff] }
  0x30   : > { %542 = vmatpush.msrb.mxu2 %v397_v57  ;;  %470 = vmatpush.msra.mxu3 %v1084_v58  ;;  %v1121_v31 = vld [vmem:[%s1964_s3 + $0x1e8] sm:$0xff]  ;;  %v1118_v33 = vld [vmem:[%s1964_s3 + $0x1d0] sm:$0xff]  ;;  %v1119_v34 = vld [vmem:[%s1964_s3 + $0x1d8] sm:$0xff] }
  0x31   : > { %493 = vmatpush.msrb.mxu0 %v1085_v59  ;;  %520 = vmatpush.msrb.mxu1 %v394_v60  ;;  %v1230_v35 = vld [vmem:[%s1963_s2] ss:$0 sm:$0xff]  ;;  %v1117_v37 = vld [vmem:[%s1964_s3 + $0x1c8] sm:$0xff]  ;;  %v699_v55 = vld [vmem:[%s1966_s5 + $0x170] sm:$0xff] }
  0x32   : > { %543 = vmatpush.msrb.mxu2 %v395_v61  ;;  %471 = vmatpush.msra.mxu3 %v1082_v62  ;;  %v1116_v36 = vld [vmem:[%s1964_s3 + $0x1c0] sm:$0xff]  ;;  %v695_v57 = vld [vmem:[%s1966_s5 + $0x150] sm:$0xff] }
  0x33   : > { %494 = vmatpush.msrb.mxu0 %v1083_v63  ;;  %521 = vmatpush.msrb.mxu1 %v392_v0  ;;  %v697_v56 = vld [vmem:[%s1966_s5 + $0x160] sm:$0xff]  ;;  %v683_v58 = vld [vmem:[%s1966_s5 + $0xf0] sm:$0xff] }
  0x34   : > { %544 = vmatpush.msrb.mxu2 %v393_v1  ;;  %472 = vmatpush.msra.mxu3 %v1080_v2  ;;  %v693_v59 = vld [vmem:[%s1966_s5 + $0x140] sm:$0xff]  ;;  %v691_v61 = vld [vmem:[%s1966_s5 + $0x130] sm:$0xff] }
  0x35   : > { %495 = vmatpush.msrb.mxu0 %v1081_v3  ;;  %522 = vmatpush.msrb.mxu1 %v390_v4  ;;  %v681_v60 = vld [vmem:[%s1966_s5 + $0xe0] sm:$0xff]  ;;  %v679_v62 = vld [vmem:[%s1966_s5 + $0xd0] sm:$0xff] }
  0x36   : > { %545 = vmatpush.msrb.mxu2 %v391_v5  ;;  %591 = vmatpush.msrb.mxu3 %v1142_v6  ;;  %v689_v63 = vld [vmem:[%s1966_s5 + $0x120] sm:$0xff]  ;;  %v687_v1 = vld [vmem:[%s1966_s5 + $0x110] sm:$0xff]  ;;  %v684_v5 = vld [vmem:[%s1966_s5 + $0xf8] sm:$0xff] }
  0x37   : > { %614 = vmatpush.msra.mxu0 %v1143_v7  ;;  %708 = vmatpush.msra.mxu1 %v683_v58  ;;  %v677_v0 = vld [vmem:[%s1966_s5 + $0xc0] sm:$0xff]  ;;  %v675_v2 = vld [vmem:[%s1966_s5 + $0xb0] sm:$0xff]  ;;  %v700_v6 = vld [vmem:[%s1966_s5 + $0x178] sm:$0xff] }
  0x38   : > { %592 = vmatpush.msrb.mxu3 %v1140_v8  ;;  %739 = vmatpush.msra.mxu2 %v699_v55  ;;  %v685_v3 = vld [vmem:[%s1966_s5 + $0x100] sm:$0xff]  ;;  %v671_v7 = vld [vmem:[%s1966_s5 + $0x90] sm:$0xff]  ;;  %v682_v8 = vld [vmem:[%s1966_s5 + $0xe8] sm:$0xff] }
  0x39   : > { %615 = vmatpush.msra.mxu0 %v1141_v9  ;;  %709 = vmatpush.msra.mxu1 %v681_v60  ;;  %v673_v4 = vld [vmem:[%s1966_s5 + $0xa0] sm:$0xff]  ;;  %v698_v9 = vld [vmem:[%s1966_s5 + $0x168] sm:$0xff] }
  0x3a   : > { %593 = vmatpush.msrb.mxu3 %v1138_v10  ;;  %740 = vmatpush.msra.mxu2 %v697_v56  ;;  %v669_v10 = vld [vmem:[%s1966_s5 + $0x80] sm:$0xff] }
  0x3b   : > { %616 = vmatpush.msra.mxu0 %v1139_v11  ;;  %710 = vmatpush.msra.mxu1 %v679_v62  ;;  %v680_v11 = vld [vmem:[%s1966_s5 + $0xd8] sm:$0xff] }
  0x3c   : > { %594 = vmatpush.msrb.mxu3 %v1136_v12  ;;  %741 = vmatpush.msra.mxu2 %v695_v57  ;;  %v696_v12 = vld [vmem:[%s1966_s5 + $0x158] sm:$0xff] }
  0x3d   : > { %617 = vmatpush.msra.mxu0 %v1137_v13  ;;  %711 = vmatpush.msra.mxu1 %v677_v0  ;;  %v667_v13 = vld [vmem:[%s1966_s5 + $0x70] sm:$0xff] }
  0x3e   : > { %595 = vmatpush.msrb.mxu3 %v1134_v14  ;;  %742 = vmatpush.msra.mxu2 %v693_v59  ;;  %v678_v14 = vld [vmem:[%s1966_s5 + $0xc8] sm:$0xff] }
  0x3f   : > { %618 = vmatpush.msra.mxu0 %v1135_v15  ;;  %712 = vmatpush.msra.mxu1 %v675_v2  ;;  %v694_v15 = vld [vmem:[%s1966_s5 + $0x148] sm:$0xff] }
  0x40   : > { %596 = vmatpush.msrb.mxu3 %v1132_v16  ;;  %743 = vmatpush.msra.mxu2 %v691_v61  ;;  %v665_v16 = vld [vmem:[%s1966_s5 + $0x60] sm:$0xff] }
  0x41   : > { %619 = vmatpush.msra.mxu0 %v1133_v17  ;;  %713 = vmatpush.msra.mxu1 %v673_v4  ;;  %v676_v17 = vld [vmem:[%s1966_s5 + $0xb8] sm:$0xff] }
  0x42   : > { %597 = vmatpush.msrb.mxu3 %v1130_v18  ;;  %744 = vmatpush.msra.mxu2 %v689_v63  ;;  %v692_v18 = vld [vmem:[%s1966_s5 + $0x138] sm:$0xff] }
  0x43   : > { %620 = vmatpush.msra.mxu0 %v1131_v19  ;;  %714 = vmatpush.msra.mxu1 %v671_v7  ;;  %v663_v19 = vld [vmem:[%s1966_s5 + $0x50] sm:$0xff] }
  0x44   : > { %598 = vmatpush.msrb.mxu3 %v1128_v20  ;;  %745 = vmatpush.msra.mxu2 %v687_v1  ;;  %v674_v20 = vld [vmem:[%s1966_s5 + $0xa8] sm:$0xff] }
  0x45   : > { %621 = vmatpush.msra.mxu0 %v1129_v21  ;;  %715 = vmatpush.msra.mxu1 %v669_v10  ;;  %v690_v21 = vld [vmem:[%s1966_s5 + $0x128] sm:$0xff] }
  0x46   : > { %599 = vmatpush.msrb.mxu3 %v1126_v22  ;;  %746 = vmatpush.msra.mxu2 %v685_v3  ;;  %v661_v22 = vld [vmem:[%s1966_s5 + $0x40] sm:$0xff] }
  0x47   : > { %622 = vmatpush.msra.mxu0 %v1127_v23  ;;  %716 = vmatpush.msra.mxu1 %v667_v13  ;;  %v672_v23 = vld [vmem:[%s1966_s5 + $0x98] sm:$0xff] }
  0x48   : > { %600 = vmatpush.msrb.mxu3 %v1124_v24  ;;  %v688_v24 = vld [vmem:[%s1966_s5 + $0x118] sm:$0xff] }
  0x49   : > { %623 = vmatpush.msra.mxu0 %v1125_v25  ;;  %717 = vmatpush.msra.mxu1 %v665_v16  ;;  %v659_v25 = vld [vmem:[%s1966_s5 + $0x30] sm:$0xff] }
  0x4a   : > { %601 = vmatpush.msrb.mxu3 %v1122_v28  ;;  %v657_v28 = vld [vmem:[%s1966_s5 + $0x20] sm:$0xff] }
  0x4b   : > { %624 = vmatpush.msra.mxu0 %v1123_v29  ;;  %718 = vmatpush.msra.mxu1 %v663_v19  ;;  %v668_v29 = vld [vmem:[%s1966_s5 + $0x78] sm:$0xff] }
  0x4c   : > { %602 = vmatpush.msrb.mxu3 %v1120_v30  ;;  %v655_v30 = vld [vmem:[%s1966_s5 + $0x10] sm:$0xff] }
  0x4d   : > { %625 = vmatpush.msra.mxu0 %v1121_v31  ;;  %719 = vmatpush.msra.mxu1 %v661_v22  ;;  %v666_v31 = vld [vmem:[%s1966_s5 + $0x68] sm:$0xff] }
  0x4e   : > { %603 = vmatpush.msrb.mxu3 %v1118_v33  ;;  %v664_v33 = vld [vmem:[%s1966_s5 + $0x58] sm:$0xff] }
  0x4f   : > { %626 = vmatpush.msra.mxu0 %v1119_v34  ;;  %720 = vmatpush.msra.mxu1 %v659_v25  ;;  %v662_v34 = vld [vmem:[%s1966_s5 + $0x48] sm:$0xff]  ;;  %v1295_v25 = vmov 1.0  }
  0x50   : > { %604 = vmatpush.msrb.mxu3 %v1116_v36  ;;  %v658_v36 = vld [vmem:[%s1966_s5 + $0x28] sm:$0xff] }
  0x51   : > { %627 = vmatpush.msra.mxu0 %v1117_v37  ;;  %721 = vmatpush.msra.mxu1 %v657_v28 }
  0x53   : > { %722 = vmatpush.msra.mxu1 %v655_v30 }
  0x97   : > { %v340_v26 = vpop.f32.mrf.mxu1 }
  0x9b   : > { %v313_v27 = vpop.f32.mrf.mxu0 }
  0x9c   : > { %v341_v32 = vadd.f32 %v340_v26, %v313_v27  ;;  %v670_v26 = vld [vmem:[%s1966_s5 + $0x88] sm:$0xff] }
  0x9d   : > { %v686_v27 = vld [vmem:[%s1966_s5 + $0x108] sm:$0xff] }
  0xa0   : > { %v343_v41 = vpop.f32.mrf.mxu1 }
  0xa1   : > { %v374_v38 = vpop.f32.mrf.mxu2 }
  0xa2   : > { %v380_v39 = vadd.f32 %v374_v38, %v341_v32  ;;  %v653_v32 = vld [vmem:[%s1966_s5] sm:$0xff]  ;;  %v656_v38 = vld [vmem:[%s1966_s5 + $0x18] sm:$0xff] }
  0xa3   : > { %v316_v40 = vpop.f32.mrf.mxu0  ;;  %723 = vmatpush.msra.mxu1 %v653_v32 }
  0xa4   : > { %v386_v42 = vadd.f32 %v1230_v35, %v380_v39  ;;  %v344_v44 = vadd.f32 %v343_v41, %v316_v40  ;;  %v654_v39 = vld [vmem:[%s1966_s5 + $0x8] sm:$0xff] }
  0xa6   : > { %v388_v43 = vmax.f32 %v386_v42, 0.0 }
  0xa8   : > { %1112 = vmatmul.msk.f32.vlgmr.msrb.gmra.mxu1 %vm452_vm3, %v388_v43  ;;  %1114 = vmatmul.msk.f32.vlgmr.msrb.gmra.mxu2 %vm452_vm3, %v388_v43  ;;  %v449_v49 = vrot.slane %v388_v43, 1  ;;  %v582_v53 = vrot.slane %v388_v43, 2  ;;  %v639_v43 = vld [vmem:[%s1965_s4] sm:$0x3] }
  0xa9   : > { %v377_v45 = vpop.f32.mrf.mxu2  ;;  %754 = vmatpush.msrb.mxu2 %v684_v5  ;;  %1181 = vmatpush.msrb.mxu1 %v700_v6 }
  0xaa   : > { %v381_v46 = vadd.f32 %v377_v45, %v344_v44 }
  0xab   : > { %755 = vmatpush.msrb.mxu2 %v682_v8  ;;  %1182 = vmatpush.msrb.mxu1 %v698_v9 }
  0xac   : > { %v387_v47 = vadd.f32 %v1230_v35, %v381_v46  ;;  %v660_v35 = vld [vmem:[%s1966_s5 + $0x38] sm:$0xff]  ;;  %v642_v46 = vperm.slane %v639_v43, 1 }
  0xad   : > { %756 = vmatpush.msrb.mxu2 %v680_v11  ;;  %1183 = vmatpush.msrb.mxu1 %v696_v12 }
  0xae   : > { %v389_v48 = vmax.f32 %v387_v47, 0.0 }
  0xaf   : > { %757 = vmatpush.msrb.mxu2 %v678_v14  ;;  %1184 = vmatpush.msrb.mxu1 %v694_v15 }
  0xb0   : > { %1113 = vmatmul.msk.f32.gmra.mxu1 %vm452_vm3, %v389_v48  ;;  %1115 = vmatmul.msk.f32.gmra.mxu2 %vm452_vm3, %v389_v48  ;;  %v450_v50 = vrot.slane %v389_v48, 1  ;;  %v583_v52 = vrot.slane %v389_v48, 2 }
  0xb1   : > { %758 = vmatpush.msrb.mxu2 %v676_v17  ;;  %1185 = vmatpush.msrb.mxu1 %v692_v18 }
  0xb2   : > { %v451_v51 = vsel %vm287_vm2, %v449_v49, %v450_v50  ;;  %v584_v54 = vsel %vm349_vm1, %v582_v53, %v583_v52  ;;  %v641_v53 = vperm.slane %v639_v43, 0 }
  0xb3   : > { %1108 = vmatmul.msk.f32.vlgmr.msra.gmra.mxu3 %vm452_vm3, %v451_v51  ;;  %1110 = vmatmul.msk.f32.vlgmr.msrb.gmra.mxu0 %vm452_vm3, %v451_v51 }
  0xb4   : > { %785 = vmatpush.msrb.mxu0 %v700_v6  ;;  %759 = vmatpush.msrb.mxu2 %v674_v20  ;;  %v800_v6 = vlaneseq }
  0xb5   : > { %1186 = vmatpush.msrb.mxu1 %v690_v21 }
  0xb6   : > { %786 = vmatpush.msrb.mxu0 %v698_v9  ;;  %760 = vmatpush.msrb.mxu2 %v672_v23  ;;  %v1835_v7 = vshrl.u32 %v800_v6, 7  ;;  %v1843_v14 = vand.u32 127, %v800_v6 }
  0xb7   : > { %1187 = vmatpush.msrb.mxu1 %v688_v24 }
  0xb8   : > { %787 = vmatpush.msrb.mxu0 %v696_v12  ;;  %761 = vmatpush.msrb.mxu2 %v670_v26  ;;  %v885_v8 = vadd.s32 120, %v1835_v7  ;;  %v884_v9 = vadd.s32 112, %v1835_v7  ;;  %v883_v10 = vadd.s32 104, %v1835_v7  ;;  %v1841_v13 = vadd.s32 8, %v1835_v7 }
  0xb9   : > { %1188 = vmatpush.msrb.mxu1 %v686_v27  ;;  %v881_v19 = vadd.s32 88, %v1835_v7  ;;  %v808_v23 = vand.u32 15, %v1843_v14  ;;  %v806_v28 = vand.u32 15, %v1835_v7  ;;  %v878_v30 = vadd.s32 64, %v1835_v7 }
  0xba   : > { %788 = vmatpush.msrb.mxu0 %v694_v15  ;;  %762 = vmatpush.msrb.mxu2 %v668_v29  ;;  %v882_v15 = vadd.s32 96, %v1835_v7  ;;  %v905_v16 = vshra.s32 %v885_v8, 4  ;;  %v904_v17 = vshra.s32 %v884_v9, 4  ;;  %v807_v22 = vand.u32 15, %v1841_v13 }
  0xbb   : > { %1109 = vmatmul.msk.f32.gmra.mxu3 %vm452_vm3, %v450_v50  ;;  %1111 = vmatmul.msk.f32.gmra.mxu0 %vm452_vm3, %v450_v50  ;;  %v901_v26 = vshra.s32 %v881_v19, 4  ;;  %vm810_vm13 = vcmp.eq.s32.totalorder %v806_v28, %v808_v23 }
  0xbc   : > { %789 = vmatpush.msrb.mxu0 %v692_v18  ;;  %763 = vmatpush.msrb.mxu2 %v666_v31  ;;  %v903_v18 = vshra.s32 %v883_v10, 4  ;;  %vm925_vm5 = vcmp.eq.s32.totalorder %v905_v16, %v1843_v14  ;;  %vm924_vm6 = vcmp.eq.s32.totalorder %v904_v17, %v1843_v14  ;;  %v902_v20 = vshra.s32 %v882_v15, 4  ;;  %v950_v10 = vld [vmem:[%s1967_s6] sm:$0x1] }
  0xbd   : > { %1158 = vmatpush.msk.msra.mxu3 %vm925_vm5, %v1295_v25  ;;  %vm1862_vm9 = vcmp.eq.s32.totalorder %v807_v22, %v808_v23  ;;  %vm921_vm12 = vcmp.eq.s32.totalorder %v901_v26, %v1843_v14 }
  0xbe   : > { %790 = vmatpush.msrb.mxu0 %v690_v21  ;;  %764 = vmatpush.msrb.mxu2 %v664_v33  ;;  %v880_v21 = vadd.s32 80, %v1835_v7  ;;  %vm923_vm7 = vcmp.eq.s32.totalorder %v903_v18, %v1843_v14  ;;  %vm922_vm8 = vcmp.eq.s32.totalorder %v902_v20, %v1843_v14 }
  0xbf   : > { %1159 = vmatpush.msk.msra.mxu3 %vm924_vm6, %v1295_v25 }
  0xc0   : > { %791 = vmatpush.msrb.mxu0 %v688_v24  ;;  %765 = vmatpush.msrb.mxu2 %v662_v34  ;;  %v818_v24 = vshra.s32 %v1843_v14, 4  ;;  %v900_v29 = vshra.s32 %v880_v21, 4 }
  0xc1   : > { %1160 = vmatpush.msk.msra.mxu3 %vm923_vm7, %v1295_v25 }
  0xc2   : > { %792 = vmatpush.msrb.mxu0 %v686_v27  ;;  %766 = vmatpush.msrb.mxu2 %v660_v35  ;;  %v879_v27 = vadd.s32 72, %v1835_v7  ;;  %vm819_vm11 = vcmp.eq.s32.totalorder %v818_v24, %v1835_v7  ;;  %vm920_vm14 = vcmp.eq.s32.totalorder %v900_v29, %v1843_v14 }
  0xc3   : > { %1144 = vmatmul.msk.f32.vlgmr.msrb.gmra.mxu3 %vm452_vm3, %v584_v54  ;;  %1146 = vmatmul.msk.f32.vlgmr.msra.gmra.mxu0 %vm452_vm3, %v584_v54 }
  0xc4   : > { %767 = vmatpush.msrb.mxu2 %v658_v36  ;;  %v899_v35 = vshra.s32 %v879_v27, 4  ;;  %v877_v36 = vadd.s32 56, %v1835_v7  ;;  %1161 = vmatpush.msk.msra.mxu3 %vm922_vm8, %v1295_v25 }
  0xc6   : > { %768 = vmatpush.msrb.mxu2 %v656_v38  ;;  %v898_v38 = vshra.s32 %v878_v30, 4  ;;  %1162 = vmatpush.msk.msra.mxu3 %vm921_vm12, %v1295_v25  ;;  %vm919_vm0 = vcmp.eq.s32.totalorder %v899_v35, %v1843_v14  ;;  %v897_v43 = vshra.s32 %v877_v36, 4 }
  0xc8   : > { %769 = vmatpush.msrb.mxu2 %v654_v39  ;;  %v876_v39 = vadd.s32 48, %v1835_v7  ;;  %1163 = vmatpush.msk.msra.mxu3 %vm920_vm14, %v1295_v25  ;;  %vm918_vm1 = vcmp.eq.s32.totalorder %v898_v38, %v1843_v14  ;;  %vm917_vm2 = vcmp.eq.s32.totalorder %v897_v43, %v1843_v14 }
  0xca   : > { %1164 = vmatpush.msk.msra.mxu3 %vm919_vm0, %v1295_v25  ;;  %vm951_vm0 = vcmask 261120  }
  0xcb   : > { %1145 = vmatmul.msk.f32.gmra.mxu3 %vm452_vm3, %v583_v52  ;;  %1147 = vmatmul.msk.f32.gmra.mxu0 %vm452_vm3, %v583_v52 }
  0xcc   : > { %1165 = vmatpush.msk.msra.mxu3 %vm918_vm1, %v1295_v25 }
  0xce   : > { %1166 = vmatpush.msk.msra.mxu3 %vm917_vm2, %v1295_v25 }
 0x125   : > { %v524_v49 = vpop.f32.mrf.mxu1 }
 0x12b   : > { %v547_v42 = vpop.f32.mrf.mxu2 }
 0x12d   : > { %v527_v63 = vpop.f32.mrf.mxu1 }
 0x130   : > { %v497_v37 = vpop.f32.mrf.mxu0 }
 0x131   : > { %v548_v45 = vadd.f32 %v547_v42, %v497_v37 }
 0x133   : > { %v550_v54 = vpop.f32.mrf.mxu2 }
 0x136   : > { %v474_v40 = vpop.f32.mrf.mxu3 }
 0x137   : > { %v525_v51 = vadd.f32 %v524_v49, %v474_v40 }
 0x138   : > { %v500_v41 = vpop.f32.mrf.mxu0 }
 0x139   : > { %v551_v56 = vadd.f32 %v550_v54, %v500_v41  ;;  %v1296_v41 = vmov 0.0  }
 0x13a   : > { %v820_v42 = vsel %vm819_vm11, 1.0, %v1296_v41 }
 0x13e   : > { %v477_v44 = vpop.f32.mrf.mxu3 }
 0x13f   : > { %v528_v0 = vadd.f32 %v527_v63, %v477_v44  ;;  %v875_v44 = vadd.s32 40, %v1835_v7  ;;  %v890_v63 = vshra.s32 %v1835_v7, 4 }
 0x140   : > { %v629_v47 = vpop.f32.mrf.mxu0 }
 0x141   : > { %v636_v48 = vadd.f32 %v629_v47, %v548_v45  ;;  %v896_v45 = vshra.s32 %v876_v39, 4  ;;  %v895_v49 = vshra.s32 %v875_v44, 4 }
 0x143   : > { %v646_v50 = vadd.f32 %v642_v46, %v636_v48  ;;  %v805_v48 = vadd.s32 128, %v1843_v14  ;;  %vm916_vm3 = vcmp.eq.s32.totalorder %v896_v45, %v1843_v14 }
 0x144   : > { %1167 = vmatpush.msk.msra.mxu3 %vm916_vm3, %v1295_v25 }
 0x145   : > { %v650_v52 = vmax.f32 %v646_v50, 0.0  ;;  %v873_v50 = vadd.s32 24, %v1835_v7 }
 0x146   : > { %v606_v55 = vpop.f32.mrf.mxu3 }
 0x147   : > { %v635_v57 = vadd.f32 %v606_v55, %v525_v51  ;;  %1148 = vmatmul.msk.f32.vlgmr.msra.gmra.mxu2 %vm701_vm4, %v650_v52  ;;  %1150 = vmatmul.msk.f32.vlgmr.msrb.gmra.mxu0 %vm701_vm4, %v650_v52  ;;  %v872_v52 = vadd.s32 16, %v1835_v7  ;;  %v893_v54 = vshra.s32 %v873_v50, 4 }
 0x148   : > { %v632_v58 = vpop.f32.mrf.mxu0 }
 0x149   : > { %v645_v59 = vadd.f32 %v641_v53, %v635_v57  ;;  %v638_v60 = vadd.f32 %v632_v58, %v551_v56  ;;  %v892_v55 = vshra.s32 %v872_v52, 4  ;;  %vm913_vm7 = vcmp.eq.s32.totalorder %v893_v54, %v1843_v14 }
 0x14b   : > { %v649_v61 = vmax.f32 %v645_v59, 0.0  ;;  %v648_v62 = vadd.f32 %v642_v46, %v638_v60  ;;  %v874_v46 = vadd.s32 32, %v1835_v7  ;;  %v891_v59 = vshra.s32 %v1841_v13, 4 }
 0x14d   : > { %v652_v1 = vmax.f32 %v648_v62, 0.0  ;;  %724 = vmatmul.f32.vlgmr.msra.gmra.mxu1 %v649_v61  ;;  %v894_v51 = vshra.s32 %v874_v46, 4  ;;  %vm911_vm11 = vcmp.eq.s32.totalorder %v891_v59, %v1843_v14 }
 0x14e   : > { %v609_v2 = vpop.f32.mrf.mxu3 }
 0x14f   : > { %v637_v3 = vadd.f32 %v609_v2, %v528_v0  ;;  %1149 = vmatmul.msk.f32.gmra.mxu2 %vm701_vm4, %v652_v1  ;;  %vm914_vm5 = vcmp.eq.s32.totalorder %v894_v51, %v1843_v14  ;;  %v889_v0 = vadd.s32 152, %v1835_v7  ;;  %v887_v2 = vadd.s32 136, %v1835_v7 }
 0x151   : > { %v647_v4 = vadd.f32 %v641_v53, %v637_v3  ;;  %v809_v53 = vand.u32 15, %v805_v48  ;;  %v886_v3 = vadd.s32 128, %v1835_v7  ;;  %v907_v6 = vshra.s32 %v887_v2, 4 }
 0x153   : > { %v651_v5 = vmax.f32 %v647_v4, 0.0  ;;  %vm813_vm6 = vcmp.eq.s32.totalorder %v807_v22, %v809_v53  ;;  %vm811_vm8 = vcmp.eq.s32.totalorder %v806_v28, %v809_v53  ;;  %v909_v4 = vshra.s32 %v889_v0, 4 }
 0x154   : > { %v906_v8 = vshra.s32 %v886_v3, 4  ;;  %vm927_vm14 = vcmp.eq.s32.totalorder %v907_v6, %v1843_v14 }
 0x155   : > { %727 = vmatmul.f32.gmra.mxu1 %v651_v5  ;;  %vm929_vm12 = vcmp.eq.s32.totalorder %v909_v4, %v1843_v14 }
 0x157   : > { %770 = vmatmul.f32.vlgmr.msrb.gmra.mxu2 %v649_v61 }
 0x15d   : > { %1151 = vmatmul.msk.f32.vlgmr.msrb.gmra.mxu1 %vm701_vm4, %v652_v1  ;;  %vm915_vm4 = vcmp.eq.s32.totalorder %v895_v49, %v1843_v14  ;;  %v888_v1 = vadd.s32 144, %v1835_v7 }
 0x15e   : > { %1168 = vmatpush.msk.msra.mxu3 %vm915_vm4, %v1295_v25 }
 0x15f   : > { %773 = vmatmul.f32.gmra.mxu2 %v651_v5  ;;  %v908_v5 = vshra.s32 %v888_v1, 4 }
 0x160   : > { %1169 = vmatpush.msk.msra.mxu3 %vm914_vm5, %v1295_v25 }
 0x162   : > { %1170 = vmatpush.msk.msra.mxu3 %vm913_vm7, %v1295_v25 }
 0x1c4   : > { %v794_v60 = vpop.f32.mrf.mxu0 }
 0x1ca   : > { %v725_v11 = vpop.f32.mrf.mxu1  ;;  %v748_v12 = vpop.f32.mrf.mxu2 }
 0x1cb   : > { %v749_v40 = vadd.f32 %v748_v12, %v725_v11 }
 0x1d2   : > { %v728_v31 = vpop.f32.mrf.mxu1  ;;  %v751_v32 = vpop.f32.mrf.mxu2 }
 0x1d3   : > { %v752_v34 = vadd.f32 %v751_v32, %v728_v31 }
 0x1d5   : > { %v816_v37 = vsel %vm1862_vm9, %v752_v34, 0.0  ;;  %vm912_vm9 = vcmp.eq.s32.totalorder %v892_v55, %v1843_v14 }
 0x1d6   : > { %1152 = vmatpush.msk.msra.mxu0 %vm825_vm10, %v816_v37  ;;  %1171 = vmatpush.msk.msra.mxu3 %vm912_vm9, %v1295_v25 }
 0x1d8   : > { %1153 = vmatpush.msk.msra.mxu0 %vm810_vm13, %v749_v40  ;;  %1172 = vmatpush.msk.msra.mxu3 %vm911_vm11, %v1295_v25  ;;  %vm928_vm13 = vcmp.eq.s32.totalorder %v908_v5, %v1843_v14 }
 0x1d9   : > { %1154 = vmatmul.msk.f32.vlgmr.msra.gmra.mxu0 %vm821_vm15, %v820_v42 }
 0x1da   : > { %v771_v47 = vpop.f32.mrf.mxu2  ;;  %v797_v56 = vpop.f32.mrf.mxu1  ;;  %1174 = vmatpush.msk.msrb.mxu0 %vm929_vm12, %v1295_v25 }
 0x1db   : > { %v795_v62 = vadd.f32 %v794_v60, %v771_v47 }
 0x1dc   : > { %1175 = vmatpush.msk.msrb.mxu0 %vm928_vm13, %v1295_v25 }
 0x1de   : > { %1176 = vmatpush.msk.msrb.mxu0 %vm927_vm14, %v1295_v25 }
 0x1e2   : > { %v774_v57 = vpop.f32.mrf.mxu2 }
 0x1e3   : > { %v798_v58 = vadd.f32 %v797_v56, %v774_v57 }
 0x1e5   : > { %v817_v61 = vsel %vm813_vm6, %v798_v58, 0.0 }
 0x1e6   : > { %1155 = vmatpush.msk.msra.mxu1 %vm825_vm10, %v817_v61  ;;  %vm910_vm10 = vcmp.eq.s32.totalorder %v890_v63, %v1843_v14 }
 0x1e7   : > { %1173 = vmatpush.msk.msra.mxu3 %vm910_vm10, %v1295_v25 }
 0x1e8   : > { %1156 = vmatpush.msk.msra.mxu1 %vm811_vm8, %v795_v62 }
 0x1e9   : > { %1157 = vmatmul.msk.f32.vlgmr.msra.gmra.mxu1 %vm821_vm15, %v820_v42  ;;  %vm926_vm15 = vcmp.eq.s32.totalorder %v906_v8, %v1843_v14 }
 0x1ea   : > { %1177 = vmatpush.msk.msrb.mxu0 %vm926_vm15, %v1295_v25 }
 0x256   : > { %v849_v7 = vpop.f32.mrf.mxu0 }
 0x257   : > { %971 = vmatmul.f32.vlgmr.msra.gmra.mxu3 %v849_v7 }
 0x266   : > { %v869_v9 = vpop.f32.mrf.mxu1 }
 0x267   : > { %1178 = vmatmul.msk.f32.vlgmr.msrb.gmra.mxu0 %vm951_vm0, %v869_v9 }
 0x2da   : > { %v972_v11 = vpop.f32.mrf.mxu3 }
 0x2db   : > { %v973_v12 = vadd.f32 %v972_v11, %v950_v10 }
 0x2e4   : > { %v992_v13 = vpop.f32.mrf.mxu0 }
 0x2e5   : > { %v993_v14 = vadd.f32 %v992_v13, %v973_v12 }
 0x2e7   : > { %995 = vst [vmem:[%s271_s8] sm:$0x1] %v993_v14 }
 0x2e8   : > { %1258 = shalt.err (!%p1255_p3)
}
 0x2e9   : > { %1189 = dma.vmem_to_hbm [thread:$0]  (%p1375_p5), %s1008_s9, 16, %s1010_s13, %s997_s14  }
 0x2ea PF: > { %p1195_p4 = scmp.ge.s32.totalorder %s1293_s27, 2  ;;  %s1021_s20 = sand.u32 1, %s1281_s24  }
 0x2eb   : > { %s1022_s23 = scalar_lea.sflag [#allocation3], %s1021_s20 }
 0x2ec   : > { %p1192_p7 = pnand %p1195_p4, %p1379_p6 }
 0x2ee   : > { %p1193_p8 = pneg %p1192_p7 }
 0x2f0   : > { %1276 = dma.done.wait (%p1193_p8), %s1022_s23, 16  }
 0x2f1   : > { %1278 = vsyncadd (%p1193_p8), %s1022_s23, 4294967280  ;;  %p17_p9 = scmp.ge.s32.totalorder %s1362_s30, 4   ;;  %s1973_s24 = smov %s1285_s25 }
 0x2f2   : > { %s1974_s25 = smov %s1289_s26  ;;  %s1975_s26 = smov %s1373_s10 }
 0x2f3   : > { %s1976_s27 = smov %s1362_s30  ;;  %19 = sbr.rel (!%p17_p9) target bundleno = 3 (0x3), region = 87 }
 0x2f8   :  { %1027 = vsyncpa [#allocation3], 1 }
 0x2f9   :  { %1029 = vsyncpa [#allocation3 + $0x1], 1 }

</bundles_post_ra>
